<compile_context>
chip_gen: v5e
topology: v5e:2x2
jax: 0.10.0
libtpu: 0.0.40
codegen_flags: <defaults>
</compile_context>

<pallas_src>
import functools

import jax
import jax.numpy as jnp
from jax.experimental import pallas as pl
from jax.experimental.pallas import tpu as pltpu

HIDDEN = 30
N_MID_LAYERS = 6        # number of Linear(30,30) layers (each followed by Tanh)
TILE_N = 4096           # samples per grid step (batch is on the lane axis)


def _mlp_kernel(x_ref, w1_ref, b1_ref, wh_ref, bh_ref, wo_ref, bo_ref, o_ref):
    # Transposed compute: activations are (HIDDEN, TILE_N), batch on lanes.
    x = x_ref[...]                                          # (1, TILE_N)

    # Layer 0: Linear(1,30)+Tanh as a VPU broadcast multiply-add
    # (avoids an essentially empty K=1 MXU pass at the head of the dep chain).
    h = jnp.tanh(w1_ref[...] * x + b1_ref[...])             # (30, TILE_N)

    # Layers 1..6: Linear(30,30)+Tanh.  PyTorch-native (out,in) weights multiply
    # the transposed activations directly: h <- tanh(W @ h + b).
    # Static Python loop -> fully unrolled, visible to the LLO scheduler.
    for li in range(N_MID_LAYERS):
        w = wh_ref[li]                                      # (30, 30)
        b = bh_ref[li]                                      # (30, 1)
        h = jnp.tanh(jnp.dot(w, h, preferred_element_type=jnp.float32) + b)

    # Final Linear(30,1): (1,30) @ (30,TILE_N) -> lane-dense (1, TILE_N)
    out = jnp.dot(wo_ref[...], h, preferred_element_type=jnp.float32) + bo_ref[...]
    o_ref[...] = out.astype(o_ref.dtype)


def _round_up(x, m):
    return ((x + m - 1) // m) * m


@functools.partial(jax.jit, static_argnames=("tile_n",))
def ode_solver_forward(x, params, tile_n=TILE_N):
    """x: (N, 1) float32.  Returns (N, 1) float32."""
    assert tile_n % 128 == 0, "tile_n must be a multiple of 128"
    w1, b1, wh, bh, wo, bo = params
    n = x.shape[0]

    # Put the batch on the lane axis: (N, 1) -> (1, N).
    xt = x.reshape(1, n)

    # Effective tile: multiple of 128, no larger than needed for small batches.
    eff_tile = min(tile_n, _round_up(n, 128))
    padded_n = _round_up(n, eff_tile)
    if padded_n != n:
        xt = jnp.pad(xt, ((0, 0), (0, padded_n - n)))

    def whole(shape):
        # Whole-array block with a constant index_map -> stays resident in VMEM
        # across grid steps (no per-step re-DMA).
        nd = len(shape)
        return pl.BlockSpec(shape, lambda i, _nd=nd: (0,) * _nd)

    out = pl.pallas_call(
        _mlp_kernel,
        out_shape=jax.ShapeDtypeStruct((1, padded_n), jnp.float32),
        grid_spec=pltpu.PrefetchScalarGridSpec(
            num_scalar_prefetch=0,
            grid=(padded_n // eff_tile,),
            in_specs=[
                pl.BlockSpec((1, eff_tile), lambda i: (0, i)),  # x (batch tiled)
                whole(w1.shape),   # (30, 1)
                whole(b1.shape),   # (30, 1)
                whole(wh.shape),   # (6, 30, 30)
                whole(bh.shape),   # (6, 30, 1)
                whole(wo.shape),   # (1, 30)
                whole(bo.shape),   # (1, 1)
            ],
            out_specs=pl.BlockSpec((1, eff_tile), lambda i: (0, i)),
        ),
        compiler_params=pltpu.CompilerParams(
            dimension_semantics=("parallel",),
        ),
    )(xt, w1, b1, wh, bh, wo, bo)

    return out[:, :n].reshape(n, 1)


def _xavier_uniform(key, fan_out, fan_in, dtype=jnp.float32):
    # matches torch.nn.init.xavier_uniform_ for nn.Linear(fan_in, fan_out);
    # weight stored in PyTorch-native (out, in) layout.
    bound = float(jnp.sqrt(6.0 / (fan_in + fan_out)))
    return jax.random.uniform(
        key, (fan_out, fan_in), dtype=dtype, minval=-bound, maxval=bound
    )


def init_params(key):
    k1, kmid, ko = jax.random.split(key, 3)
    w1 = _xavier_uniform(k1, HIDDEN, 1)                        # (30, 1)
    b1 = jnp.ones((HIDDEN, 1), jnp.float32)                    # constant_(bias, 1)
    kmids = jax.random.split(kmid, N_MID_LAYERS)
    wh = jnp.stack([_xavier_uniform(k, HIDDEN, HIDDEN) for k in kmids])  # (6,30,30)
    bh = jnp.ones((N_MID_LAYERS, HIDDEN, 1), jnp.float32)
    wo = _xavier_uniform(ko, 1, HIDDEN)                         # (1, 30)
    bo = jnp.ones((1, 1), jnp.float32)
    return (w1, b1, wh, bh, wo, bo)


def ode_solver_reference(x, params):
    """Pure-JAX reference mirroring PyTorch's y = x @ W.T + b per layer."""
    w1, b1, wh, bh, wo, bo = params
    h = jnp.tanh(x @ w1.T + b1.reshape(1, -1))
    for li in range(N_MID_LAYERS):
        h = jnp.tanh(h @ wh[li].T + bh[li].reshape(1, -1))
    return h @ wo.T + bo.reshape(1, -1)


if __name__ == "__main__":
    key = jax.random.PRNGKey(0)
    k_param, k_x = jax.random.split(key)

    params = init_params(k_param)

    # Small demo: N deliberately NOT a multiple of the tile to exercise padding;
    # tile_n=512 -> padded to 1024 -> 2 grid steps (also feeds both v7x cores).
    N = 1000
    x = jax.random.uniform(k_x, (N, 1), dtype=jnp.float32, minval=0.0, maxval=2.0)

    y = ode_solver_forward(x, params, tile_n=512)
    y = jax.block_until_ready(y)

    y_ref = ode_solver_reference(x, params)
    assert y.shape == (N, 1)
    assert jnp.allclose(y, y_ref, atol=1e-4, rtol=1e-4), "mismatch vs reference"

    print("KERNEL_OK")
</pallas_src>

<mosaic_0001>
module attributes {stable_mosaic.version = 11 : i64} {
  func.func @_mlp_kernel(%arg0: i32, %arg1: memref<1x512xf32, #tpu.memory_space<vmem>>, %arg2: memref<30x1xf32, #tpu.memory_space<vmem>>, %arg3: memref<30x1xf32, #tpu.memory_space<vmem>>, %arg4: memref<6x30x30xf32, #tpu.memory_space<vmem>>, %arg5: memref<6x30x1xf32, #tpu.memory_space<vmem>>, %arg6: memref<1x30xf32, #tpu.memory_space<vmem>>, %arg7: memref<1x1xf32, #tpu.memory_space<vmem>>, %arg8: memref<1x512xf32, #tpu.memory_space<vmem>>) attributes {dimension_semantics = [#tpu.dimension_semantics<parallel>], iteration_bounds = array<i64: 2>, scalar_prefetch = 0 : i64, scratch_operands = 0 : i64, tpu.core_type = #tpu.core_type<tc>, window_params = [{transform_indices = @transform_0, window_bounds = array<i64: 1, 512>}, {pipeline_mode = #tpu.pipeline_mode<synchronous>, transform_indices = @transform_1, window_bounds = array<i64: 30, 1>}, {pipeline_mode = #tpu.pipeline_mode<synchronous>, transform_indices = @transform_2, window_bounds = array<i64: 30, 1>}, {pipeline_mode = #tpu.pipeline_mode<synchronous>, transform_indices = @transform_3, window_bounds = array<i64: 6, 30, 30>}, {pipeline_mode = #tpu.pipeline_mode<synchronous>, transform_indices = @transform_4, window_bounds = array<i64: 6, 30, 1>}, {pipeline_mode = #tpu.pipeline_mode<synchronous>, transform_indices = @transform_5, window_bounds = array<i64: 1, 30>}, {pipeline_mode = #tpu.pipeline_mode<synchronous>, transform_indices = @transform_6, window_bounds = array<i64: 1, 1>}, {transform_indices = @transform_7, window_bounds = array<i64: 1, 512>}]} {
    %c0 = arith.constant 0 : index
    %c0_0 = arith.constant 0 : index
    %0 = vector.load %arg1[%c0, %c0_0] : memref<1x512xf32, #tpu.memory_space<vmem>>, vector<1x512xf32>
    %c0_1 = arith.constant 0 : index
    %c0_2 = arith.constant 0 : index
    %1 = vector.load %arg2[%c0_1, %c0_2] : memref<30x1xf32, #tpu.memory_space<vmem>>, vector<30x1xf32>
    %2 = vector.broadcast %1 : vector<30x1xf32> to vector<30x512xf32>
    %3 = vector.broadcast %0 : vector<1x512xf32> to vector<30x512xf32>
    %4 = arith.mulf %2, %3 : vector<30x512xf32>
    %c0_3 = arith.constant 0 : index
    %c0_4 = arith.constant 0 : index
    %5 = vector.load %arg3[%c0_3, %c0_4] : memref<30x1xf32, #tpu.memory_space<vmem>>, vector<30x1xf32>
    %6 = vector.broadcast %5 : vector<30x1xf32> to vector<30x512xf32>
    %7 = arith.addf %4, %6 : vector<30x512xf32>
    %8 = math.tanh %7 : vector<30x512xf32>
    %c0_5 = arith.constant 0 : index
    %c0_6 = arith.constant 0 : index
    %c0_7 = arith.constant 0 : index
    %9 = vector.load %arg4[%c0_5, %c0_6, %c0_7] : memref<6x30x30xf32, #tpu.memory_space<vmem>>, vector<1x30x30xf32>
    %10 = vector.shape_cast %9 : vector<1x30x30xf32> to vector<30x30xf32>
    %c0_8 = arith.constant 0 : index
    %c0_9 = arith.constant 0 : index
    %c0_10 = arith.constant 0 : index
    %11 = vector.load %arg5[%c0_8, %c0_9, %c0_10] : memref<6x30x1xf32, #tpu.memory_space<vmem>>, vector<1x30x1xf32>
    %12 = vector.shape_cast %11 : vector<1x30x1xf32> to vector<30x1xf32>
    %cst = arith.constant dense<0.000000e+00> : vector<30x512xf32>
    %13 = tpu.matmul %10, %8, %cst {dimension_numbers = #tpu.dot_dimension_numbers<[1], [0], [0], [1], [0, 0, 1, 1], [], []>} : vector<30x30xf32>, vector<30x512xf32>, vector<30x512xf32> -> vector<30x512xf32>
    %14 = vector.broadcast %12 : vector<30x1xf32> to vector<30x512xf32>
    %15 = arith.addf %13, %14 : vector<30x512xf32>
    %16 = math.tanh %15 : vector<30x512xf32>
    %c1 = arith.constant 1 : index
    %c0_11 = arith.constant 0 : index
    %c0_12 = arith.constant 0 : index
    %17 = vector.load %arg4[%c1, %c0_11, %c0_12] : memref<6x30x30xf32, #tpu.memory_space<vmem>>, vector<1x30x30xf32>
    %18 = vector.shape_cast %17 : vector<1x30x30xf32> to vector<30x30xf32>
    %c1_13 = arith.constant 1 : index
    %c0_14 = arith.constant 0 : index
    %c0_15 = arith.constant 0 : index
    %19 = vector.load %arg5[%c1_13, %c0_14, %c0_15] : memref<6x30x1xf32, #tpu.memory_space<vmem>>, vector<1x30x1xf32>
    %20 = vector.shape_cast %19 : vector<1x30x1xf32> to vector<30x1xf32>
    %cst_16 = arith.constant dense<0.000000e+00> : vector<30x512xf32>
    %21 = tpu.matmul %18, %16, %cst_16 {dimension_numbers = #tpu.dot_dimension_numbers<[1], [0], [0], [1], [0, 0, 1, 1], [], []>} : vector<30x30xf32>, vector<30x512xf32>, vector<30x512xf32> -> vector<30x512xf32>
    %22 = vector.broadcast %20 : vector<30x1xf32> to vector<30x512xf32>
    %23 = arith.addf %21, %22 : vector<30x512xf32>
    %24 = math.tanh %23 : vector<30x512xf32>
    %c2 = arith.constant 2 : index
    %c0_17 = arith.constant 0 : index
    %c0_18 = arith.constant 0 : index
    %25 = vector.load %arg4[%c2, %c0_17, %c0_18] : memref<6x30x30xf32, #tpu.memory_space<vmem>>, vector<1x30x30xf32>
    %26 = vector.shape_cast %25 : vector<1x30x30xf32> to vector<30x30xf32>
    %c2_19 = arith.constant 2 : index
    %c0_20 = arith.constant 0 : index
    %c0_21 = arith.constant 0 : index
    %27 = vector.load %arg5[%c2_19, %c0_20, %c0_21] : memref<6x30x1xf32, #tpu.memory_space<vmem>>, vector<1x30x1xf32>
    %28 = vector.shape_cast %27 : vector<1x30x1xf32> to vector<30x1xf32>
    %cst_22 = arith.constant dense<0.000000e+00> : vector<30x512xf32>
    %29 = tpu.matmul %26, %24, %cst_22 {dimension_numbers = #tpu.dot_dimension_numbers<[1], [0], [0], [1], [0, 0, 1, 1], [], []>} : vector<30x30xf32>, vector<30x512xf32>, vector<30x512xf32> -> vector<30x512xf32>
    %30 = vector.broadcast %28 : vector<30x1xf32> to vector<30x512xf32>
    %31 = arith.addf %29, %30 : vector<30x512xf32>
    %32 = math.tanh %31 : vector<30x512xf32>
    %c3 = arith.constant 3 : index
    %c0_23 = arith.constant 0 : index
    %c0_24 = arith.constant 0 : index
    %33 = vector.load %arg4[%c3, %c0_23, %c0_24] : memref<6x30x30xf32, #tpu.memory_space<vmem>>, vector<1x30x30xf32>
    %34 = vector.shape_cast %33 : vector<1x30x30xf32> to vector<30x30xf32>
    %c3_25 = arith.constant 3 : index
    %c0_26 = arith.constant 0 : index
    %c0_27 = arith.constant 0 : index
    %35 = vector.load %arg5[%c3_25, %c0_26, %c0_27] : memref<6x30x1xf32, #tpu.memory_space<vmem>>, vector<1x30x1xf32>
    %36 = vector.shape_cast %35 : vector<1x30x1xf32> to vector<30x1xf32>
    %cst_28 = arith.constant dense<0.000000e+00> : vector<30x512xf32>
    %37 = tpu.matmul %34, %32, %cst_28 {dimension_numbers = #tpu.dot_dimension_numbers<[1], [0], [0], [1], [0, 0, 1, 1], [], []>} : vector<30x30xf32>, vector<30x512xf32>, vector<30x512xf32> -> vector<30x512xf32>
    %38 = vector.broadcast %36 : vector<30x1xf32> to vector<30x512xf32>
    %39 = arith.addf %37, %38 : vector<30x512xf32>
    %40 = math.tanh %39 : vector<30x512xf32>
    %c4 = arith.constant 4 : index
    %c0_29 = arith.constant 0 : index
    %c0_30 = arith.constant 0 : index
    %41 = vector.load %arg4[%c4, %c0_29, %c0_30] : memref<6x30x30xf32, #tpu.memory_space<vmem>>, vector<1x30x30xf32>
    %42 = vector.shape_cast %41 : vector<1x30x30xf32> to vector<30x30xf32>
    %c4_31 = arith.constant 4 : index
    %c0_32 = arith.constant 0 : index
    %c0_33 = arith.constant 0 : index
    %43 = vector.load %arg5[%c4_31, %c0_32, %c0_33] : memref<6x30x1xf32, #tpu.memory_space<vmem>>, vector<1x30x1xf32>
    %44 = vector.shape_cast %43 : vector<1x30x1xf32> to vector<30x1xf32>
    %cst_34 = arith.constant dense<0.000000e+00> : vector<30x512xf32>
    %45 = tpu.matmul %42, %40, %cst_34 {dimension_numbers = #tpu.dot_dimension_numbers<[1], [0], [0], [1], [0, 0, 1, 1], [], []>} : vector<30x30xf32>, vector<30x512xf32>, vector<30x512xf32> -> vector<30x512xf32>
    %46 = vector.broadcast %44 : vector<30x1xf32> to vector<30x512xf32>
    %47 = arith.addf %45, %46 : vector<30x512xf32>
    %48 = math.tanh %47 : vector<30x512xf32>
    %c5 = arith.constant 5 : index
    %c0_35 = arith.constant 0 : index
    %c0_36 = arith.constant 0 : index
    %49 = vector.load %arg4[%c5, %c0_35, %c0_36] : memref<6x30x30xf32, #tpu.memory_space<vmem>>, vector<1x30x30xf32>
    %50 = vector.shape_cast %49 : vector<1x30x30xf32> to vector<30x30xf32>
    %c5_37 = arith.constant 5 : index
    %c0_38 = arith.constant 0 : index
    %c0_39 = arith.constant 0 : index
    %51 = vector.load %arg5[%c5_37, %c0_38, %c0_39] : memref<6x30x1xf32, #tpu.memory_space<vmem>>, vector<1x30x1xf32>
    %52 = vector.shape_cast %51 : vector<1x30x1xf32> to vector<30x1xf32>
    %cst_40 = arith.constant dense<0.000000e+00> : vector<30x512xf32>
    %53 = tpu.matmul %50, %48, %cst_40 {dimension_numbers = #tpu.dot_dimension_numbers<[1], [0], [0], [1], [0, 0, 1, 1], [], []>} : vector<30x30xf32>, vector<30x512xf32>, vector<30x512xf32> -> vector<30x512xf32>
    %54 = vector.broadcast %52 : vector<30x1xf32> to vector<30x512xf32>
    %55 = arith.addf %53, %54 : vector<30x512xf32>
    %56 = math.tanh %55 : vector<30x512xf32>
    %c0_41 = arith.constant 0 : index
    %c0_42 = arith.constant 0 : index
    %57 = vector.load %arg6[%c0_41, %c0_42] : memref<1x30xf32, #tpu.memory_space<vmem>>, vector<1x30xf32>
    %cst_43 = arith.constant dense<0.000000e+00> : vector<1x512xf32>
    %58 = tpu.matmul %57, %56, %cst_43 {dimension_numbers = #tpu.dot_dimension_numbers<[1], [0], [0], [1], [0, 0, 1, 1], [], []>} : vector<1x30xf32>, vector<30x512xf32>, vector<1x512xf32> -> vector<1x512xf32>
    %c0_44 = arith.constant 0 : index
    %c0_45 = arith.constant 0 : index
    %59 = vector.load %arg7[%c0_44, %c0_45] : memref<1x1xf32, #tpu.memory_space<vmem>>, vector<1x1xf32>
    %60 = vector.broadcast %59 : vector<1x1xf32> to vector<1x512xf32>
    %61 = arith.addf %58, %60 : vector<1x512xf32>
    %c0_46 = arith.constant 0 : index
    %c0_47 = arith.constant 0 : index
    %62 = vector.load %arg8[%c0_46, %c0_47] : memref<1x512xf32, #tpu.memory_space<vmem>>, vector<1x512xf32>
    tpu.vector_store %arg8[%c0_46, %c0_47], %61 {strides = array<i32>} : memref<1x512xf32, #tpu.memory_space<vmem>>, vector<1x512xf32>,
    return
  }
  func.func @transform_0(%arg0: i32) -> (i32, i32) {
    %c0_i32 = arith.constant 0 : i32
    %c0_i32_0 = arith.constant 0 : i32
    return %c0_i32, %arg0 : i32, i32
  }
  func.func @transform_1(%arg0: i32) -> (i32, i32) {
    %c0_i32 = arith.constant 0 : i32
    %c0_i32_0 = arith.constant 0 : i32
    %c0_i32_1 = arith.constant 0 : i32
    return %c0_i32, %c0_i32_0 : i32, i32
  }
  func.func @transform_2(%arg0: i32) -> (i32, i32) {
    %c0_i32 = arith.constant 0 : i32
    %c0_i32_0 = arith.constant 0 : i32
    %c0_i32_1 = arith.constant 0 : i32
    return %c0_i32, %c0_i32_0 : i32, i32
  }
  func.func @transform_3(%arg0: i32) -> (i32, i32, i32) {
    %c0_i32 = arith.constant 0 : i32
    %c0_i32_0 = arith.constant 0 : i32
    %c0_i32_1 = arith.constant 0 : i32
    %c0_i32_2 = arith.constant 0 : i32
    return %c0_i32, %c0_i32_0, %c0_i32_1 : i32, i32, i32
  }
  func.func @transform_4(%arg0: i32) -> (i32, i32, i32) {
    %c0_i32 = arith.constant 0 : i32
    %c0_i32_0 = arith.constant 0 : i32
    %c0_i32_1 = arith.constant 0 : i32
    %c0_i32_2 = arith.constant 0 : i32
    return %c0_i32, %c0_i32_0, %c0_i32_1 : i32, i32, i32
  }
  func.func @transform_5(%arg0: i32) -> (i32, i32) {
    %c0_i32 = arith.constant 0 : i32
    %c0_i32_0 = arith.constant 0 : i32
    %c0_i32_1 = arith.constant 0 : i32
    return %c0_i32, %c0_i32_0 : i32, i32
  }
  func.func @transform_6(%arg0: i32) -> (i32, i32) {
    %c0_i32 = arith.constant 0 : i32
    %c0_i32_0 = arith.constant 0 : i32
    %c0_i32_1 = arith.constant 0 : i32
    return %c0_i32, %c0_i32_0 : i32, i32
  }
  func.func @transform_7(%arg0: i32) -> (i32, i32) {
    %c0_i32 = arith.constant 0 : i32
    %c0_i32_0 = arith.constant 0 : i32
    return %c0_i32, %arg0 : i32, i32
  }
}

</mosaic_0001>

<bundles_post_ra>
// kernel: ode_solver_forward.1
= control target key start
LH: loop header
LB: loop body
LE: loop exit
PB: predicated region body
PF: predicated region fallthrough
CT: control target
= control target key end

     0   :  { %s2135_s26 = smov 0   ;;  %s2457_s0 = inlined_call_operand.vmem [shape: f32[1,1024], index: 0, kind: input, shape index: {}]   ;;  %s2458_s1 = inlined_call_operand.vmem [shape: f32[30,1], index: 1, kind: input, shape index: {}]   ;;  %s2459_s2 = inlined_call_operand.vmem [shape: f32[30,1], index: 2, kind: input, shape index: {}]   ;;  %s2460_s3 = inlined_call_operand.vmem [shape: f32[6,30,30], index: 3, kind: input, shape index: {}]   ;;  %s2461_s4 = inlined_call_operand.vmem [shape: f32[6,30,1], index: 4, kind: input, shape index: {}]   ;;  %s2462_s5 = inlined_call_operand.vmem [shape: f32[1,30], index: 5, kind: input, shape index: {}]   ;;  %s2463_s6 = inlined_call_operand.<no memory space> [shape: f32[1,1], index: 6, kind: input, shape index: {}]   ;;  %s2464_s7 = inlined_call_operand.vmem [shape: f32[1,1024], index: 7, kind: output, shape index: {}]  }
   0x1   :  { %v12_v0 = vstv %s2463_s6 }
   0x2   :  { %13 = vst [vmem:[#allocation2] sm:$0x1] %v12_v0 }
   0x3 LB: > { %s1670_s27 = sadd.s32 4294967295, %s2089_s26   ;;  %p1674_p0 = scmp.ge.s32.totalorder %s2089_s26, 1  ;;  %s2089_s26 = sphi %s2135_s26, %s19_s26  }
   0x4   : > { %p239_p1 = scmp.lt.s32.totalorder %s2089_s26, 3 }
   0x6   : > { %p240_p2 = pnand %p1674_p0, %p239_p1 }
   0x7   : > { %s1675_s24 = sshll.u32 (!%p240_p2), %s1670_s27, 2 }
   0x8   : > { %243 = sbr.rel (%p240_p2) target bundleno = 1336 (0x538), region = 48  ;;  %p270_p3 = scmp.lt.s32.totalorder (!%p240_p2), %s1675_s24, 7 }
   0xd   : > { %v331_v1 = vld [vmem:[%s2459_s2 + $0x10] sm:$0xff]  ;;  %v332_v2 = vld [vmem:[%s2459_s2 + $0x18] sm:$0x3f]  ;;  %v2091_v4 = vmov 0   ;;  %v280_v5 = vld [vmem:[%s2458_s1] sm:$0xff]  ;;  %s2466_s24 = smov (!%p270_p3, %s1675_s24), 7 }
   0xe   : > { %v283_v3 = vld [vmem:[%s2458_s1 + $0x18] sm:$0x3f]  ;;  %1858 = vset.pattern.permute.xlu2 %v2091_v4  ;;  %1857 = vset.pattern.permute.xlu1 %v2091_v4  ;;  %v282_v6 = vld [vmem:[%s2458_s1 + $0x10] sm:$0xff]  ;;  %v281_v7 = vld [vmem:[%s2458_s1 + $0x8] sm:$0xff]  ;;  %s272_s29 = scalar_lea.vmem %s2457_s0, %s2466_s24  ;;  %vm426_vm0 = vcmask 1045504   ;;  %vm413_vm1 = vcmask 244736   ;;  %s277_s13 = scalar_lea.vmem %s2464_s7, %s2466_s24 }
   0xf   : > { %1856 = vset.pattern.permute.xlu0 %v2091_v4  ;;  %345 = vperm.xlu2 %1858, %v331_v1   ;;  %v392_v8 = vld [vmem:[%s2461_s4 + $0x18] sm:$0x3f]  ;;  %v330_v9 = vld [vmem:[%s2459_s2 + $0x8] sm:$0xff]  ;;  %v329_v10 = vld [vmem:[%s2459_s2] sm:$0xff]  ;;  %vm1611_vm2 = vcmask 1040384   ;;  %vm1613_vm3 = vcmask 1042434  }
  0x10   : > { %350 = vperm.xlu1 %1857, %v332_v2   ;;  %301 = vperm.xlu0 %1856, %v283_v3   ;;  %v389_v11 = vld [vmem:[%s2461_s4] sm:$0xff]  ;;  %v391_v12 = vld [vmem:[%s2461_s4 + $0x10] sm:$0xff]  ;;  %v390_v13 = vld [vmem:[%s2461_s4 + $0x8] sm:$0xff]  ;;  %vm1615_vm4 = vcmask 1041408  }
  0x11   : > { %v1702_v14 = vld [vmem:[%s2461_s4 + $0x28] sm:$0xff]  ;;  %v1704_v15 = vld [vmem:[%s2461_s4 + $0x38] sm:$0x3f]  ;;  %v1703_v16 = vld [vmem:[%s2461_s4 + $0x30] sm:$0xff] }
  0x12   : > { %v1731_v17 = vld [vmem:[%s2461_s4 + $0x50] sm:$0xff]  ;;  %v1701_v18 = vld [vmem:[%s2461_s4 + $0x20] sm:$0xff]  ;;  %v1732_v19 = vld [vmem:[%s2461_s4 + $0x58] sm:$0x3f] }
  0x13   : > { %v1760_v20 = vld [vmem:[%s2461_s4 + $0x78] sm:$0x3f]  ;;  %v1730_v21 = vld [vmem:[%s2461_s4 + $0x48] sm:$0xff]  ;;  %v1729_v22 = vld [vmem:[%s2461_s4 + $0x40] sm:$0xff] }
  0x14   : > { %v1757_v23 = vld [vmem:[%s2461_s4 + $0x60] sm:$0xff]  ;;  %v1759_v24 = vld [vmem:[%s2461_s4 + $0x70] sm:$0xff]  ;;  %v1758_v25 = vld [vmem:[%s2461_s4 + $0x68] sm:$0xff] }
  0x15   : > { %v1786_v26 = vld [vmem:[%s2461_s4 + $0x88] sm:$0xff]  ;;  %v1788_v27 = vld [vmem:[%s2461_s4 + $0x98] sm:$0x3f]  ;;  %v1787_v28 = vld [vmem:[%s2461_s4 + $0x90] sm:$0xff] }
  0x16   : > { %v1815_v29 = vld [vmem:[%s2461_s4 + $0xb0] sm:$0xff]  ;;  %v1785_v30 = vld [vmem:[%s2461_s4 + $0x80] sm:$0xff]  ;;  %v1816_v31 = vld [vmem:[%s2461_s4 + $0xb8] sm:$0x3f] }
  0x17   : > { %286 = vperm.xlu2 %1858, %v280_v5   ;;  %v1502_v32 = vld [vmem:[#allocation2] sm:$0x1]  ;;  %v1814_v33 = vld [vmem:[%s2461_s4 + $0xa8] sm:$0xff] }
  0x18   : > { %296 = vperm.xlu0 %1856, %v282_v6   ;;  %291 = vperm.xlu1 %1857, %v281_v7   ;;  %v1813_v34 = vld [vmem:[%s2461_s4 + $0xa0] sm:$0xff] }
  0x19   : > { %v279_v35 = vld [vmem:[%s272_s29] sm:$0xf] }
  0x1a   : > { %v305_v36 = vperm.slane %v279_v35, 0  ;;  %v306_v37 = vperm.slane %v279_v35, 1  ;;  %v307_v38 = vperm.slane %v279_v35, 2  ;;  %v308_v39 = vperm.slane %v279_v35, 3  ;;  %v388_v35 = vld [vmem:[%s2460_s3 + $0x18] sm:$0x3f] }
  0x1f   : > { %410 = vperm.xlu2 %1858, %v392_v8  }
  0x20   : > { %340 = vperm.xlu0 %1856, %v330_v9   ;;  %335 = vperm.xlu1 %1857, %v329_v10  }
  0x27   : > { %395 = vperm.xlu2 %1858, %v389_v11  }
  0x28   : > { %405 = vperm.xlu0 %1856, %v391_v12   ;;  %400 = vperm.xlu1 %1857, %v390_v13  }
  0x2f   : > { %588 = vperm.xlu2 %1858, %v1702_v14  }
  0x30   : > { %598 = vperm.xlu0 %1856, %v1704_v15   ;;  %593 = vperm.xlu1 %1857, %v1703_v16  }
  0x37   : > { %779 = vperm.xlu2 %1858, %v1731_v17  }
  0x38   : > { %583 = vperm.xlu0 %1856, %v1701_v18   ;;  %784 = vperm.xlu1 %1857, %v1732_v19  }
  0x3f   : > { %970 = vperm.xlu2 %1858, %v1760_v20  }
  0x40   : > { %774 = vperm.xlu0 %1856, %v1730_v21   ;;  %769 = vperm.xlu1 %1857, %v1729_v22  }
  0x47   : > { %955 = vperm.xlu2 %1858, %v1757_v23  }
  0x48   : > { %965 = vperm.xlu0 %1856, %v1759_v24   ;;  %960 = vperm.xlu1 %1857, %v1758_v25  }
  0x4f   : > { %1146 = vperm.xlu2 %1858, %v1786_v26  }
  0x50   : > { %1156 = vperm.xlu0 %1856, %v1788_v27   ;;  %1151 = vperm.xlu1 %1857, %v1787_v28   ;;  %v385_v28 = vld [vmem:[%s2460_s3] sm:$0xff] }
  0x57   : > { %1337 = vperm.xlu2 %1858, %v1815_v29  }
  0x58   : > { %1141 = vperm.xlu0 %1856, %v1785_v30   ;;  %1342 = vperm.xlu1 %1857, %v1816_v31  }
  0x5f   : > { %1505 = vperm.xlu2 %1858, %v1502_v32  }
  0x60   : > { %1332 = vperm.xlu0 %1856, %v1814_v33   ;;  %1327 = vperm.xlu1 %1857, %v1813_v34   ;;  %v386_v33 = vld [vmem:[%s2460_s3 + $0x8] sm:$0xff]  ;;  %v387_v34 = vld [vmem:[%s2460_s3 + $0x10] sm:$0xff] }
  0x69   : > { %v346_v50 = vpop.permute.xlu2 %345 }
  0x71   : > { %v287_v1 = vpop.permute.xlu2 %286 }
  0x72   : > { %v313_v8 = vmul.f32 %v305_v36, %v287_v1  ;;  %v314_v12 = vmul.f32 %v306_v37, %v287_v1  ;;  %v315_v15 = vmul.f32 %v307_v38, %v287_v1  ;;  %v316_v18 = vmul.f32 %v308_v39, %v287_v1 }
  0x82   : > { %v351_v40 = vpop.permute.xlu1 %350  ;;  %v302_v41 = vpop.permute.xlu0 %301 }
  0x83   : > { %v325_v42 = vmul.f32 %v305_v36, %v302_v41  ;;  %v326_v43 = vmul.f32 %v306_v37, %v302_v41  ;;  %v327_v44 = vmul.f32 %v307_v38, %v302_v41  ;;  %v328_v45 = vmul.f32 %v308_v39, %v302_v41 }
  0x85   : > { %v365_v46 = vadd.f32 %v351_v40, %v325_v42  ;;  %v366_v47 = vadd.f32 %v351_v40, %v326_v43  ;;  %v367_v48 = vadd.f32 %v351_v40, %v327_v44  ;;  %v368_v49 = vadd.f32 %v351_v40, %v328_v45  ;;  %v411_v42 = vpop.permute.xlu2 %410 }
  0x87   : > { %1859 = vtanh.f32 %v365_v46 }
  0x88   : > { %1861 = vtanh.f32 %v366_v47 }
  0x89   : > { %1863 = vtanh.f32 %v367_v48 }
  0x8a   : > { %v297_v51 = vpop.permute.xlu0 %296  ;;  %v292_v52 = vpop.permute.xlu1 %291  ;;  %1865 = vtanh.f32 %v368_v49 }
  0x8b   : > { %v321_v53 = vmul.f32 %v305_v36, %v297_v51  ;;  %v322_v54 = vmul.f32 %v306_v37, %v297_v51  ;;  %v323_v55 = vmul.f32 %v307_v38, %v297_v51  ;;  %v324_v56 = vmul.f32 %v308_v39, %v297_v51 }
  0x8c   : > { %v317_v2 = vmul.f32 %v305_v36, %v292_v52  ;;  %v318_v3 = vmul.f32 %v306_v37, %v292_v52  ;;  %v319_v4 = vmul.f32 %v307_v38, %v292_v52  ;;  %v320_v5 = vmul.f32 %v308_v39, %v292_v52 }
  0x8d   : > { %v1860_v57 = vpop.eup %1859  ;;  %v361_v58 = vadd.f32 %v346_v50, %v321_v53  ;;  %v362_v59 = vadd.f32 %v346_v50, %v322_v54  ;;  %v363_v60 = vadd.f32 %v346_v50, %v323_v55  ;;  %v364_v62 = vadd.f32 %v346_v50, %v324_v56  ;;  %v396_v47 = vpop.permute.xlu2 %395 }
  0x8e   : > { %v1862_v61 = vpop.eup %1861  ;;  %1677 = vmatpush.msk.msra.mxu0 %vm426_vm0, %v1860_v57 }
  0x8f   : > { %v1864_v63 = vpop.eup %1863  ;;  %1682 = vmatpush.msk.msra.mxu1 %vm426_vm0, %v1862_v61  ;;  %1867 = vtanh.f32 %v361_v58 }
  0x90   : > { %v1866_v0 = vpop.eup %1865  ;;  %1687 = vmatpush.msk.msra.mxu2 %vm426_vm0, %v1864_v63  ;;  %1869 = vtanh.f32 %v362_v59 }
  0x91   : > { %1692 = vmatpush.msk.msra.mxu3 %vm426_vm0, %v1866_v0  ;;  %1871 = vtanh.f32 %v363_v60 }
  0x92   : > { %v341_v6 = vpop.permute.xlu0 %340  ;;  %v336_v7 = vpop.permute.xlu1 %335  ;;  %1873 = vtanh.f32 %v364_v62 }
  0x93   : > { %v357_v9 = vadd.f32 %v341_v6, %v317_v2  ;;  %v358_v10 = vadd.f32 %v341_v6, %v318_v3  ;;  %v359_v11 = vadd.f32 %v341_v6, %v319_v4  ;;  %v360_v13 = vadd.f32 %v341_v6, %v320_v5 }
  0x94   : > { %v353_v16 = vadd.f32 %v336_v7, %v313_v8  ;;  %v354_v19 = vadd.f32 %v336_v7, %v314_v12  ;;  %v355_v21 = vadd.f32 %v336_v7, %v315_v15  ;;  %v356_v23 = vadd.f32 %v336_v7, %v316_v18 }
  0x95   : > { %v1868_v14 = vpop.eup %1867  ;;  %1875 = vtanh.f32 %v357_v9 }
  0x96   : > { %v1870_v17 = vpop.eup %1869  ;;  %1877 = vtanh.f32 %v358_v10  ;;  %452 = vmatpush.msra.mxu0 %v1868_v14 }
  0x97   : > { %v1872_v20 = vpop.eup %1871  ;;  %1879 = vtanh.f32 %v359_v11  ;;  %481 = vmatpush.msra.mxu1 %v1870_v17  ;;  %v1697_v17 = vld [vmem:[%s2460_s3 + $0x20] sm:$0xff] }
  0x98   : > { %v1874_v22 = vpop.eup %1873  ;;  %1881 = vtanh.f32 %v360_v13  ;;  %510 = vmatpush.msra.mxu2 %v1872_v20 }
  0x99   : > { %1883 = vtanh.f32 %v353_v16  ;;  %539 = vmatpush.msra.mxu3 %v1874_v22 }
  0x9a   : > { %1885 = vtanh.f32 %v354_v19  ;;  %v406_v55 = vpop.permute.xlu0 %405  ;;  %v401_v58 = vpop.permute.xlu1 %400 }
  0x9b   : > { %v1876_v24 = vpop.eup %1875  ;;  %1887 = vtanh.f32 %v355_v21 }
  0x9c   : > { %v1878_v25 = vpop.eup %1877  ;;  %1889 = vtanh.f32 %v356_v23  ;;  %453 = vmatpush.msra.mxu0 %v1876_v24 }
  0x9d   : > { %v1880_v26 = vpop.eup %1879  ;;  %482 = vmatpush.msra.mxu1 %v1878_v25  ;;  %v1698_v25 = vld [vmem:[%s2460_s3 + $0x28] sm:$0xff] }
  0x9e   : > { %v1882_v27 = vpop.eup %1881  ;;  %511 = vmatpush.msra.mxu2 %v1880_v26  ;;  %v1699_v26 = vld [vmem:[%s2460_s3 + $0x30] sm:$0xff] }
  0x9f   : > { %v1884_v29 = vpop.eup %1883  ;;  %540 = vmatpush.msra.mxu3 %v1882_v27  ;;  %v1700_v27 = vld [vmem:[%s2460_s3 + $0x38] sm:$0x3f] }
  0xa0   : > { %v1886_v30 = vpop.eup %1885  ;;  %454 = vmatpush.msra.mxu0 %v1884_v29 }
  0xa1   : > { %v1888_v31 = vpop.eup %1887  ;;  %483 = vmatpush.msra.mxu1 %v1886_v30  ;;  %1678 = vmatmul.msk.f32.vlgmr.msra.gmra.mxu0 %vm413_vm1, %v385_v28 }
  0xa2   : > { %v1890_v32 = vpop.eup %1889  ;;  %512 = vmatpush.msra.mxu2 %v1888_v31  ;;  %1683 = vmatmul.msk.f32.vlgmr.msra.gmra.mxu1 %vm413_vm1, %v385_v28 }
  0xa3   : > { %541 = vmatpush.msra.mxu3 %v1890_v32  ;;  %1688 = vmatmul.msk.f32.vlgmr.msra.gmra.mxu2 %vm413_vm1, %v385_v28 }
  0xa4   : > { %1693 = vmatmul.msk.f32.vlgmr.msra.gmra.mxu3 %vm413_vm1, %v385_v28 }
  0xa9   : > { %1679 = vmatmul.msk.f32.gmra.mxu0 %vm413_vm1, %v386_v33 }
  0xaa   : > { %1684 = vmatmul.msk.f32.gmra.mxu1 %vm413_vm1, %v386_v33 }
  0xab   : > { %1689 = vmatmul.msk.f32.gmra.mxu2 %vm413_vm1, %v386_v33 }
  0xac   : > { %1694 = vmatmul.msk.f32.gmra.mxu3 %vm413_vm1, %v386_v33 }
  0xb1   : > { %1680 = vmatmul.msk.f32.gmra.mxu0 %vm413_vm1, %v387_v34 }
  0xb2   : > { %1685 = vmatmul.msk.f32.gmra.mxu1 %vm413_vm1, %v387_v34 }
  0xb3   : > { %1690 = vmatmul.msk.f32.gmra.mxu2 %vm413_vm1, %v387_v34 }
  0xb4   : > { %1695 = vmatmul.msk.f32.gmra.mxu3 %vm413_vm1, %v387_v34 }
  0xb9   : > { %1681 = vmatmul.msk.f32.gmra.mxu0 %vm413_vm1, %v388_v35 }
  0xba   : > { %1686 = vmatmul.msk.f32.gmra.mxu1 %vm413_vm1, %v388_v35 }
  0xbb   : > { %1691 = vmatmul.msk.f32.gmra.mxu2 %vm413_vm1, %v388_v35 }
  0xbc   : > { %1696 = vmatmul.msk.f32.gmra.mxu3 %vm413_vm1, %v388_v35 }
 0x11e   : > { %v456_v36 = vpop.f32.mrf.mxu0 }
 0x11f   : > { %v485_v37 = vpop.f32.mrf.mxu1  ;;  %v457_v48 = vadd.f32 %v456_v36, %v396_v47  ;;  %v599_v36 = vpop.permute.xlu0 %598 }
 0x120   : > { %v486_v49 = vadd.f32 %v485_v37, %v396_v47 }
 0x121   : > { %1891 = vtanh.f32 %v457_v48 }
 0x122   : > { %1893 = vtanh.f32 %v486_v49 }
 0x126   : > { %v514_v38 = vpop.f32.mrf.mxu2  ;;  %v459_v39 = vpop.f32.mrf.mxu0 }
 0x127   : > { %v543_v40 = vpop.f32.mrf.mxu3  ;;  %v488_v41 = vpop.f32.mrf.mxu1  ;;  %v460_v60 = vadd.f32 %v459_v39, %v401_v58  ;;  %v515_v11 = vadd.f32 %v514_v38, %v396_v47 }
 0x128   : > { %v489_v61 = vadd.f32 %v488_v41, %v401_v58  ;;  %v1892_v63 = vpop.eup %1891  ;;  %v544_v13 = vadd.f32 %v543_v40, %v396_v47  ;;  %v594_v39 = vpop.permute.xlu1 %593 }
 0x129   : > { %v1894_v3 = vpop.eup %1893  ;;  %v584_v47 = vpop.permute.xlu0 %583 }
 0x12e   : > { %v517_v43 = vpop.f32.mrf.mxu2  ;;  %v462_v44 = vpop.f32.mrf.mxu0 }
 0x12f   : > { %v546_v45 = vpop.f32.mrf.mxu3  ;;  %v491_v46 = vpop.f32.mrf.mxu1  ;;  %v463_v57 = vadd.f32 %v462_v44, %v406_v55  ;;  %v518_v7 = vadd.f32 %v517_v43, %v401_v58 }
 0x130   : > { %v492_v59 = vadd.f32 %v491_v46, %v406_v55  ;;  %v547_v9 = vadd.f32 %v546_v45, %v401_v58  ;;  %v589_v45 = vpop.permute.xlu2 %588 }
 0x136   : > { %v520_v50 = vpop.f32.mrf.mxu2  ;;  %v465_v51 = vpop.f32.mrf.mxu0 }
 0x137   : > { %v549_v52 = vpop.f32.mrf.mxu3  ;;  %v466_v53 = vadd.f32 %v465_v51, %v411_v42  ;;  %v494_v54 = vpop.f32.mrf.mxu1  ;;  %v521_v0 = vadd.f32 %v520_v50, %v406_v55 }
 0x138   : > { %v495_v56 = vadd.f32 %v494_v54, %v411_v42  ;;  %v550_v4 = vadd.f32 %v549_v52, %v406_v55 }
 0x139   : > { %1895 = vtanh.f32 %v466_v53 }
 0x13a   : > { %1897 = vtanh.f32 %v495_v56 }
 0x13b   : > { %1899 = vtanh.f32 %v463_v57 }
 0x13c   : > { %1901 = vtanh.f32 %v492_v59 }
 0x13d   : > { %1903 = vtanh.f32 %v460_v60 }
 0x13e   : > { %v523_v62 = vpop.f32.mrf.mxu2  ;;  %1905 = vtanh.f32 %v489_v61 }
 0x13f   : > { %v524_v1 = vadd.f32 %v523_v62, %v411_v42  ;;  %v552_v2 = vpop.f32.mrf.mxu3  ;;  %v1896_v6 = vpop.eup %1895 }
 0x140   : > { %v553_v5 = vadd.f32 %v552_v2, %v411_v42  ;;  %v1898_v8 = vpop.eup %1897  ;;  %1705 = vmatpush.msk.msrb.mxu0 %vm426_vm0, %v1896_v6  ;;  %v1725_v2 = vld [vmem:[%s2460_s3 + $0x40] sm:$0xff] }
 0x141   : > { %1907 = vtanh.f32 %v524_v1  ;;  %v1900_v10 = vpop.eup %1899  ;;  %1710 = vmatpush.msk.msrb.mxu1 %vm426_vm0, %v1898_v8 }
 0x142   : > { %1909 = vtanh.f32 %v553_v5  ;;  %v1902_v12 = vpop.eup %1901  ;;  %638 = vmatpush.msrb.mxu0 %v1900_v10 }
 0x143   : > { %1911 = vtanh.f32 %v521_v0  ;;  %v1904_v14 = vpop.eup %1903  ;;  %667 = vmatpush.msrb.mxu1 %v1902_v12 }
 0x144   : > { %1913 = vtanh.f32 %v550_v4  ;;  %v1906_v15 = vpop.eup %1905  ;;  %639 = vmatpush.msrb.mxu0 %v1904_v14 }
 0x145   : > { %1915 = vtanh.f32 %v518_v7  ;;  %668 = vmatpush.msrb.mxu1 %v1906_v15 }
 0x146   : > { %1917 = vtanh.f32 %v547_v9  ;;  %640 = vmatpush.msrb.mxu0 %v1892_v63 }
 0x147   : > { %v1908_v16 = vpop.eup %1907  ;;  %1919 = vtanh.f32 %v515_v11  ;;  %669 = vmatpush.msrb.mxu1 %v1894_v3  ;;  %1706 = vmatmul.msk.f32.vlgmr.msrb.gmra.mxu0 %vm413_vm1, %v1697_v17  ;;  %v1726_v11 = vld [vmem:[%s2460_s3 + $0x48] sm:$0xff] }
 0x148   : > { %v1910_v18 = vpop.eup %1909  ;;  %1921 = vtanh.f32 %v544_v13  ;;  %1715 = vmatpush.msk.msrb.mxu2 %vm426_vm0, %v1908_v16  ;;  %1711 = vmatmul.msk.f32.vlgmr.msrb.gmra.mxu1 %vm413_vm1, %v1697_v17 }
 0x149   : > { %v1912_v19 = vpop.eup %1911  ;;  %1720 = vmatpush.msk.msrb.mxu3 %vm426_vm0, %v1910_v18  ;;  %v1727_v18 = vld [vmem:[%s2460_s3 + $0x50] sm:$0xff] }
 0x14a   : > { %v1914_v20 = vpop.eup %1913  ;;  %696 = vmatpush.msrb.mxu2 %v1912_v19  ;;  %v1728_v19 = vld [vmem:[%s2460_s3 + $0x58] sm:$0x3f] }
 0x14b   : > { %v1916_v21 = vpop.eup %1915  ;;  %725 = vmatpush.msrb.mxu3 %v1914_v20 }
 0x14c   : > { %v1918_v22 = vpop.eup %1917  ;;  %697 = vmatpush.msrb.mxu2 %v1916_v21 }
 0x14d   : > { %v1920_v23 = vpop.eup %1919  ;;  %726 = vmatpush.msrb.mxu3 %v1918_v22 }
 0x14e   : > { %v1922_v24 = vpop.eup %1921  ;;  %698 = vmatpush.msrb.mxu2 %v1920_v23 }
 0x14f   : > { %727 = vmatpush.msrb.mxu3 %v1922_v24  ;;  %1716 = vmatmul.msk.f32.vlgmr.msrb.gmra.mxu2 %vm413_vm1, %v1697_v17 }
 0x150   : > { %1721 = vmatmul.msk.f32.vlgmr.msrb.gmra.mxu3 %vm413_vm1, %v1697_v17  ;;  %1707 = vmatmul.msk.f32.gmra.mxu0 %vm413_vm1, %v1698_v25 }
 0x151   : > { %1712 = vmatmul.msk.f32.gmra.mxu1 %vm413_vm1, %v1698_v25 }
 0x157   : > { %1717 = vmatmul.msk.f32.gmra.mxu2 %vm413_vm1, %v1698_v25 }
 0x158   : > { %1722 = vmatmul.msk.f32.gmra.mxu3 %vm413_vm1, %v1698_v25  ;;  %1708 = vmatmul.msk.f32.gmra.mxu0 %vm413_vm1, %v1699_v26 }
 0x159   : > { %1713 = vmatmul.msk.f32.gmra.mxu1 %vm413_vm1, %v1699_v26 }
 0x15f   : > { %1718 = vmatmul.msk.f32.gmra.mxu2 %vm413_vm1, %v1699_v26 }
 0x160   : > { %1723 = vmatmul.msk.f32.gmra.mxu3 %vm413_vm1, %v1699_v26  ;;  %1709 = vmatmul.msk.f32.gmra.mxu0 %vm413_vm1, %v1700_v27  ;;  %v785_v26 = vpop.permute.xlu1 %784 }
 0x161   : > { %1714 = vmatmul.msk.f32.gmra.mxu1 %vm413_vm1, %v1700_v27 }
 0x167   : > { %1719 = vmatmul.msk.f32.gmra.mxu2 %vm413_vm1, %v1700_v27 }
 0x168   : > { %1724 = vmatmul.msk.f32.gmra.mxu3 %vm413_vm1, %v1700_v27 }
 0x1c4   : > { %v642_v28 = vpop.f32.mrf.mxu0 }
 0x1c5   : > { %v671_v29 = vpop.f32.mrf.mxu1  ;;  %v643_v52 = vadd.f32 %v642_v28, %v584_v47 }
 0x1c6   : > { %v672_v53 = vadd.f32 %v671_v29, %v584_v47  ;;  %v780_v29 = vpop.permute.xlu2 %779 }
 0x1cd   : > { %v645_v30 = vpop.f32.mrf.mxu0 }
 0x1ce   : > { %v674_v31 = vpop.f32.mrf.mxu1  ;;  %v646_v48 = vadd.f32 %v645_v30, %v589_v45 }
 0x1cf   : > { %v675_v49 = vadd.f32 %v674_v31, %v589_v45 }
 0x1d2   : > { %v700_v32 = vpop.f32.mrf.mxu2 }
 0x1d3   : > { %v729_v33 = vpop.f32.mrf.mxu3  ;;  %v701_v7 = vadd.f32 %v700_v32, %v584_v47 }
 0x1d4   : > { %v730_v8 = vadd.f32 %v729_v33, %v584_v47 }
 0x1d5   : > { %v648_v34 = vpop.f32.mrf.mxu0 }
 0x1d6   : > { %v677_v35 = vpop.f32.mrf.mxu1  ;;  %v649_v42 = vadd.f32 %v648_v34, %v594_v39  ;;  %v775_v34 = vpop.permute.xlu0 %774 }
 0x1d7   : > { %v678_v46 = vadd.f32 %v677_v35, %v594_v39 }
 0x1da   : > { %v703_v37 = vpop.f32.mrf.mxu2 }
 0x1db   : > { %v732_v38 = vpop.f32.mrf.mxu3  ;;  %v704_v4 = vadd.f32 %v703_v37, %v589_v45 }
 0x1dc   : > { %v733_v6 = vadd.f32 %v732_v38, %v589_v45 }
 0x1dd   : > { %v651_v40 = vpop.f32.mrf.mxu0 }
 0x1de   : > { %v680_v41 = vpop.f32.mrf.mxu1  ;;  %v652_v43 = vadd.f32 %v651_v40, %v599_v36  ;;  %v770_v40 = vpop.permute.xlu1 %769 }
 0x1df   : > { %v681_v44 = vadd.f32 %v680_v41, %v599_v36 }
 0x1e0   : > { %1923 = vtanh.f32 %v652_v43 }
 0x1e1   : > { %1925 = vtanh.f32 %v681_v44 }
 0x1e2   : > { %v706_v50 = vpop.f32.mrf.mxu2  ;;  %1927 = vtanh.f32 %v649_v42 }
 0x1e3   : > { %v735_v51 = vpop.f32.mrf.mxu3  ;;  %1929 = vtanh.f32 %v678_v46  ;;  %v707_v61 = vadd.f32 %v706_v50, %v594_v39 }
 0x1e4   : > { %1931 = vtanh.f32 %v646_v48  ;;  %v736_v1 = vadd.f32 %v735_v51, %v594_v39 }
 0x1e5   : > { %1933 = vtanh.f32 %v675_v49 }
 0x1e6   : > { %v1924_v54 = vpop.eup %1923  ;;  %1935 = vtanh.f32 %v643_v52  ;;  %v1753_v52 = vld [vmem:[%s2460_s3 + $0x60] sm:$0xff] }
 0x1e7   : > { %v1926_v55 = vpop.eup %1925  ;;  %1937 = vtanh.f32 %v672_v53  ;;  %1733 = vmatpush.msk.msra.mxu0 %vm426_vm0, %v1924_v54 }
 0x1e8   : > { %v1928_v56 = vpop.eup %1927  ;;  %1738 = vmatpush.msk.msra.mxu1 %vm426_vm0, %v1926_v55 }
 0x1e9   : > { %v1930_v57 = vpop.eup %1929  ;;  %824 = vmatpush.msra.mxu0 %v1928_v56 }
 0x1ea   : > { %v709_v58 = vpop.f32.mrf.mxu2  ;;  %v1932_v60 = vpop.eup %1931  ;;  %853 = vmatpush.msra.mxu1 %v1930_v57 }
 0x1eb   : > { %v738_v59 = vpop.f32.mrf.mxu3  ;;  %v710_v62 = vadd.f32 %v709_v58, %v599_v36  ;;  %v1934_v0 = vpop.eup %1933  ;;  %825 = vmatpush.msra.mxu0 %v1932_v60 }
 0x1ec   : > { %v739_v63 = vadd.f32 %v738_v59, %v599_v36  ;;  %v1936_v3 = vpop.eup %1935  ;;  %854 = vmatpush.msra.mxu1 %v1934_v0 }
 0x1ed   : > { %1939 = vtanh.f32 %v710_v62  ;;  %v1938_v5 = vpop.eup %1937  ;;  %826 = vmatpush.msra.mxu0 %v1936_v3 }
 0x1ee   : > { %1941 = vtanh.f32 %v739_v63  ;;  %855 = vmatpush.msra.mxu1 %v1938_v5  ;;  %1734 = vmatmul.msk.f32.vlgmr.msra.gmra.mxu0 %vm413_vm1, %v1725_v2  ;;  %v1754_v63 = vld [vmem:[%s2460_s3 + $0x68] sm:$0xff] }
 0x1ef   : > { %1943 = vtanh.f32 %v707_v61  ;;  %1739 = vmatmul.msk.f32.vlgmr.msra.gmra.mxu1 %vm413_vm1, %v1725_v2 }
 0x1f0   : > { %1945 = vtanh.f32 %v736_v1 }
 0x1f1   : > { %1947 = vtanh.f32 %v704_v4 }
 0x1f2   : > { %1949 = vtanh.f32 %v733_v6  ;;  %v1755_v6 = vld [vmem:[%s2460_s3 + $0x70] sm:$0xff] }
 0x1f3   : > { %v1940_v9 = vpop.eup %1939  ;;  %1951 = vtanh.f32 %v701_v7 }
 0x1f4   : > { %v1942_v10 = vpop.eup %1941  ;;  %1953 = vtanh.f32 %v730_v8  ;;  %1743 = vmatpush.msk.msra.mxu2 %vm426_vm0, %v1940_v9 }
 0x1f5   : > { %v1944_v12 = vpop.eup %1943  ;;  %1748 = vmatpush.msk.msra.mxu3 %vm426_vm0, %v1942_v10 }
 0x1f6   : > { %v1946_v13 = vpop.eup %1945  ;;  %882 = vmatpush.msra.mxu2 %v1944_v12  ;;  %1735 = vmatmul.msk.f32.gmra.mxu0 %vm413_vm1, %v1726_v11 }
 0x1f7   : > { %v1948_v14 = vpop.eup %1947  ;;  %911 = vmatpush.msra.mxu3 %v1946_v13  ;;  %1740 = vmatmul.msk.f32.gmra.mxu1 %vm413_vm1, %v1726_v11 }
 0x1f8   : > { %v1950_v15 = vpop.eup %1949  ;;  %883 = vmatpush.msra.mxu2 %v1948_v14 }
 0x1f9   : > { %v1952_v16 = vpop.eup %1951  ;;  %912 = vmatpush.msra.mxu3 %v1950_v15 }
 0x1fa   : > { %v1954_v17 = vpop.eup %1953  ;;  %884 = vmatpush.msra.mxu2 %v1952_v16 }
 0x1fb   : > { %913 = vmatpush.msra.mxu3 %v1954_v17  ;;  %1744 = vmatmul.msk.f32.vlgmr.msra.gmra.mxu2 %vm413_vm1, %v1725_v2 }
 0x1fc   : > { %1749 = vmatmul.msk.f32.vlgmr.msra.gmra.mxu3 %vm413_vm1, %v1725_v2 }
 0x1fe   : > { %1736 = vmatmul.msk.f32.gmra.mxu0 %vm413_vm1, %v1727_v18 }
 0x1ff   : > { %1741 = vmatmul.msk.f32.gmra.mxu1 %vm413_vm1, %v1727_v18 }
 0x203   : > { %1745 = vmatmul.msk.f32.gmra.mxu2 %vm413_vm1, %v1726_v11 }
 0x204   : > { %1750 = vmatmul.msk.f32.gmra.mxu3 %vm413_vm1, %v1726_v11  ;;  %v1756_v11 = vld [vmem:[%s2460_s3 + $0x78] sm:$0x3f] }
 0x206   : > { %1737 = vmatmul.msk.f32.gmra.mxu0 %vm413_vm1, %v1728_v19 }
 0x207   : > { %1742 = vmatmul.msk.f32.gmra.mxu1 %vm413_vm1, %v1728_v19 }
 0x20b   : > { %1746 = vmatmul.msk.f32.gmra.mxu2 %vm413_vm1, %v1727_v18 }
 0x20c   : > { %1751 = vmatmul.msk.f32.gmra.mxu3 %vm413_vm1, %v1727_v18  ;;  %v971_v18 = vpop.permute.xlu2 %970 }
 0x213   : > { %1747 = vmatmul.msk.f32.gmra.mxu2 %vm413_vm1, %v1728_v19 }
 0x214   : > { %1752 = vmatmul.msk.f32.gmra.mxu3 %vm413_vm1, %v1728_v19  ;;  %v966_v19 = vpop.permute.xlu0 %965 }
 0x26b   : > { %v828_v20 = vpop.f32.mrf.mxu0 }
 0x26c   : > { %v857_v21 = vpop.f32.mrf.mxu1  ;;  %v829_v42 = vadd.f32 %v828_v20, %v770_v40 }
 0x26d   : > { %v858_v43 = vadd.f32 %v857_v21, %v770_v40 }
 0x273   : > { %v831_v22 = vpop.f32.mrf.mxu0 }
 0x274   : > { %v860_v23 = vpop.f32.mrf.mxu1  ;;  %v832_v38 = vadd.f32 %v831_v22, %v775_v34 }
 0x275   : > { %v861_v41 = vadd.f32 %v860_v23, %v775_v34 }
 0x27b   : > { %v834_v24 = vpop.f32.mrf.mxu0 }
 0x27c   : > { %v863_v25 = vpop.f32.mrf.mxu1  ;;  %v835_v31 = vadd.f32 %v834_v24, %v780_v29 }
 0x27d   : > { %v864_v35 = vadd.f32 %v863_v25, %v780_v29 }
 0x27e   : > { %v886_v27 = vpop.f32.mrf.mxu2 }
 0x27f   : > { %v915_v28 = vpop.f32.mrf.mxu3  ;;  %v887_v0 = vadd.f32 %v886_v27, %v770_v40 }
 0x280   : > { %v916_v1 = vadd.f32 %v915_v28, %v770_v40 }
 0x283   : > { %v837_v30 = vpop.f32.mrf.mxu0 }
 0x284   : > { %v838_v32 = vadd.f32 %v837_v30, %v785_v26  ;;  %v866_v33 = vpop.f32.mrf.mxu1  ;;  %v956_v30 = vpop.permute.xlu2 %955 }
 0x285   : > { %v867_v36 = vadd.f32 %v866_v33, %v785_v26 }
 0x286   : > { %v889_v37 = vpop.f32.mrf.mxu2  ;;  %1955 = vtanh.f32 %v838_v32 }
 0x287   : > { %v918_v39 = vpop.f32.mrf.mxu3  ;;  %1957 = vtanh.f32 %v867_v36  ;;  %v890_v61 = vadd.f32 %v889_v37, %v775_v34 }
 0x288   : > { %1959 = vtanh.f32 %v835_v31  ;;  %v919_v62 = vadd.f32 %v918_v39, %v775_v34 }
 0x289   : > { %1961 = vtanh.f32 %v864_v35 }
 0x28a   : > { %1963 = vtanh.f32 %v832_v38 }
 0x28b   : > { %1965 = vtanh.f32 %v861_v41 }
 0x28c   : > { %v1956_v44 = vpop.eup %1955  ;;  %1967 = vtanh.f32 %v829_v42  ;;  %v1781_v42 = vld [vmem:[%s2460_s3 + $0x80] sm:$0xff] }
 0x28d   : > { %v1958_v45 = vpop.eup %1957  ;;  %1969 = vtanh.f32 %v858_v43  ;;  %1761 = vmatpush.msk.msrb.mxu0 %vm426_vm0, %v1956_v44 }
 0x28e   : > { %v892_v46 = vpop.f32.mrf.mxu2  ;;  %v1960_v47 = vpop.eup %1959  ;;  %1766 = vmatpush.msk.msrb.mxu1 %vm426_vm0, %v1958_v45 }
 0x28f   : > { %v921_v48 = vpop.f32.mrf.mxu3  ;;  %v1962_v49 = vpop.eup %1961  ;;  %1010 = vmatpush.msrb.mxu0 %v1960_v47  ;;  %v893_v56 = vadd.f32 %v892_v46, %v780_v29  ;;  %v1782_v47 = vld [vmem:[%s2460_s3 + $0x88] sm:$0xff] }
 0x290   : > { %v1964_v50 = vpop.eup %1963  ;;  %1039 = vmatpush.msrb.mxu1 %v1962_v49  ;;  %v922_v59 = vadd.f32 %v921_v48, %v780_v29 }
 0x291   : > { %v1966_v51 = vpop.eup %1965  ;;  %1011 = vmatpush.msrb.mxu0 %v1964_v50 }
 0x292   : > { %v1968_v53 = vpop.eup %1967  ;;  %1040 = vmatpush.msrb.mxu1 %v1966_v51 }
 0x293   : > { %v1970_v54 = vpop.eup %1969  ;;  %1012 = vmatpush.msrb.mxu0 %v1968_v53 }
 0x294   : > { %1041 = vmatpush.msrb.mxu1 %v1970_v54  ;;  %1762 = vmatmul.msk.f32.vlgmr.msrb.gmra.mxu0 %vm413_vm1, %v1753_v52 }
 0x295   : > { %1767 = vmatmul.msk.f32.vlgmr.msrb.gmra.mxu1 %vm413_vm1, %v1753_v52 }
 0x296   : > { %v895_v55 = vpop.f32.mrf.mxu2 }
 0x297   : > { %v896_v57 = vadd.f32 %v895_v55, %v785_v26  ;;  %v924_v58 = vpop.f32.mrf.mxu3 }
 0x298   : > { %v925_v60 = vadd.f32 %v924_v58, %v785_v26  ;;  %v961_v26 = vpop.permute.xlu1 %960  ;;  %v1783_v58 = vld [vmem:[%s2460_s3 + $0x90] sm:$0xff] }
 0x299   : > { %1971 = vtanh.f32 %v896_v57 }
 0x29a   : > { %1973 = vtanh.f32 %v925_v60 }
 0x29b   : > { %1975 = vtanh.f32 %v893_v56 }
 0x29c   : > { %1977 = vtanh.f32 %v922_v59  ;;  %1763 = vmatmul.msk.f32.gmra.mxu0 %vm413_vm1, %v1754_v63 }
 0x29d   : > { %1979 = vtanh.f32 %v890_v61  ;;  %1768 = vmatmul.msk.f32.gmra.mxu1 %vm413_vm1, %v1754_v63 }
 0x29e   : > { %1981 = vtanh.f32 %v919_v62 }
 0x29f   : > { %v1972_v2 = vpop.eup %1971  ;;  %1983 = vtanh.f32 %v887_v0 }
 0x2a0   : > { %v1974_v3 = vpop.eup %1973  ;;  %1985 = vtanh.f32 %v916_v1  ;;  %1771 = vmatpush.msk.msrb.mxu2 %vm426_vm0, %v1972_v2  ;;  %v1784_v1 = vld [vmem:[%s2460_s3 + $0x98] sm:$0x3f] }
 0x2a1   : > { %v1976_v4 = vpop.eup %1975  ;;  %1776 = vmatpush.msk.msrb.mxu3 %vm426_vm0, %v1974_v3 }
 0x2a2   : > { %v1978_v5 = vpop.eup %1977  ;;  %1068 = vmatpush.msrb.mxu2 %v1976_v4 }
 0x2a3   : > { %v1980_v7 = vpop.eup %1979  ;;  %1097 = vmatpush.msrb.mxu3 %v1978_v5 }
 0x2a4   : > { %v1982_v8 = vpop.eup %1981  ;;  %1069 = vmatpush.msrb.mxu2 %v1980_v7  ;;  %1764 = vmatmul.msk.f32.gmra.mxu0 %vm413_vm1, %v1755_v6 }
 0x2a5   : > { %v1984_v9 = vpop.eup %1983  ;;  %1098 = vmatpush.msrb.mxu3 %v1982_v8  ;;  %1769 = vmatmul.msk.f32.gmra.mxu1 %vm413_vm1, %v1755_v6 }
 0x2a6   : > { %v1986_v10 = vpop.eup %1985  ;;  %1070 = vmatpush.msrb.mxu2 %v1984_v9 }
 0x2a7   : > { %1099 = vmatpush.msrb.mxu3 %v1986_v10  ;;  %1772 = vmatmul.msk.f32.vlgmr.msrb.gmra.mxu2 %vm413_vm1, %v1753_v52  ;;  %v1157_v10 = vpop.permute.xlu0 %1156 }
 0x2a8   : > { %1777 = vmatmul.msk.f32.vlgmr.msrb.gmra.mxu3 %vm413_vm1, %v1753_v52 }
 0x2ac   : > { %1765 = vmatmul.msk.f32.gmra.mxu0 %vm413_vm1, %v1756_v11 }
 0x2ad   : > { %1770 = vmatmul.msk.f32.gmra.mxu1 %vm413_vm1, %v1756_v11 }
 0x2af   : > { %1773 = vmatmul.msk.f32.gmra.mxu2 %vm413_vm1, %v1754_v63 }
 0x2b0   : > { %1778 = vmatmul.msk.f32.gmra.mxu3 %vm413_vm1, %v1754_v63 }
 0x2b7   : > { %1774 = vmatmul.msk.f32.gmra.mxu2 %vm413_vm1, %v1755_v6 }
 0x2b8   : > { %1779 = vmatmul.msk.f32.gmra.mxu3 %vm413_vm1, %v1755_v6 }
 0x2bf   : > { %1775 = vmatmul.msk.f32.gmra.mxu2 %vm413_vm1, %v1756_v11 }
 0x2c0   : > { %1780 = vmatmul.msk.f32.gmra.mxu3 %vm413_vm1, %v1756_v11  ;;  %v1152_v11 = vpop.permute.xlu1 %1151 }
 0x311   : > { %v1014_v12 = vpop.f32.mrf.mxu0 }
 0x312   : > { %v1043_v13 = vpop.f32.mrf.mxu1  ;;  %v1015_v32 = vadd.f32 %v1014_v12, %v956_v30 }
 0x313   : > { %v1044_v33 = vadd.f32 %v1043_v13, %v956_v30 }
 0x319   : > { %v1017_v14 = vpop.f32.mrf.mxu0 }
 0x31a   : > { %v1046_v15 = vpop.f32.mrf.mxu1  ;;  %v1018_v29 = vadd.f32 %v1017_v14, %v961_v26 }
 0x31b   : > { %v1047_v31 = vadd.f32 %v1046_v15, %v961_v26 }
 0x321   : > { %v1020_v16 = vpop.f32.mrf.mxu0 }
 0x322   : > { %v1049_v17 = vpop.f32.mrf.mxu1  ;;  %v1021_v22 = vadd.f32 %v1020_v16, %v966_v19  ;;  %v1147_v16 = vpop.permute.xlu2 %1146 }
 0x323   : > { %v1050_v27 = vadd.f32 %v1049_v17, %v966_v19 }
 0x329   : > { %v1023_v20 = vpop.f32.mrf.mxu0 }
 0x32a   : > { %v1072_v21 = vpop.f32.mrf.mxu2  ;;  %v1024_v23 = vadd.f32 %v1023_v20, %v971_v18  ;;  %v1052_v24 = vpop.f32.mrf.mxu1 }
 0x32b   : > { %v1101_v25 = vpop.f32.mrf.mxu3  ;;  %v1053_v28 = vadd.f32 %v1052_v24, %v971_v18  ;;  %v1073_v56 = vadd.f32 %v1072_v21, %v956_v30  ;;  %v1142_v20 = vpop.permute.xlu0 %1141 }
 0x32c   : > { %1987 = vtanh.f32 %v1024_v23  ;;  %v1102_v57 = vadd.f32 %v1101_v25, %v956_v30 }
 0x32d   : > { %1989 = vtanh.f32 %v1053_v28 }
 0x32e   : > { %1991 = vtanh.f32 %v1021_v22 }
 0x32f   : > { %1993 = vtanh.f32 %v1050_v27 }
 0x330   : > { %1995 = vtanh.f32 %v1018_v29 }
 0x331   : > { %1997 = vtanh.f32 %v1047_v31 }
 0x332   : > { %v1075_v34 = vpop.f32.mrf.mxu2  ;;  %v1988_v35 = vpop.eup %1987  ;;  %1999 = vtanh.f32 %v1015_v32  ;;  %v1809_v32 = vld [vmem:[%s2460_s3 + $0xa0] sm:$0xff] }
 0x333   : > { %v1104_v36 = vpop.f32.mrf.mxu3  ;;  %v1990_v37 = vpop.eup %1989  ;;  %2001 = vtanh.f32 %v1044_v33  ;;  %1789 = vmatpush.msk.msra.mxu0 %vm426_vm0, %v1988_v35  ;;  %v1076_v54 = vadd.f32 %v1075_v34, %v961_v26 }
 0x334   : > { %v1992_v38 = vpop.eup %1991  ;;  %1794 = vmatpush.msk.msra.mxu1 %vm426_vm0, %v1990_v37  ;;  %v1105_v55 = vadd.f32 %v1104_v36, %v961_v26  ;;  %v1810_v37 = vld [vmem:[%s2460_s3 + $0xa8] sm:$0xff] }
 0x335   : > { %v1994_v39 = vpop.eup %1993  ;;  %1196 = vmatpush.msra.mxu0 %v1992_v38 }
 0x336   : > { %v1996_v40 = vpop.eup %1995  ;;  %1225 = vmatpush.msra.mxu1 %v1994_v39 }
 0x337   : > { %v1998_v41 = vpop.eup %1997  ;;  %1197 = vmatpush.msra.mxu0 %v1996_v40  ;;  %v1811_v40 = vld [vmem:[%s2460_s3 + $0xb0] sm:$0xff] }
 0x338   : > { %v2000_v43 = vpop.eup %1999  ;;  %1226 = vmatpush.msra.mxu1 %v1998_v41 }
 0x339   : > { %v2002_v44 = vpop.eup %2001  ;;  %1198 = vmatpush.msra.mxu0 %v2000_v43 }
 0x33a   : > { %v1078_v45 = vpop.f32.mrf.mxu2  ;;  %1227 = vmatpush.msra.mxu1 %v2002_v44  ;;  %1790 = vmatmul.msk.f32.vlgmr.msra.gmra.mxu0 %vm413_vm1, %v1781_v42 }
 0x33b   : > { %v1107_v46 = vpop.f32.mrf.mxu3  ;;  %1795 = vmatmul.msk.f32.vlgmr.msra.gmra.mxu1 %vm413_vm1, %v1781_v42  ;;  %v1079_v49 = vadd.f32 %v1078_v45, %v966_v19 }
 0x33c   : > { %v1108_v52 = vadd.f32 %v1107_v46, %v966_v19 }
 0x342   : > { %v1081_v48 = vpop.f32.mrf.mxu2  ;;  %1791 = vmatmul.msk.f32.gmra.mxu0 %vm413_vm1, %v1782_v47 }
 0x343   : > { %v1082_v50 = vadd.f32 %v1081_v48, %v971_v18  ;;  %v1110_v51 = vpop.f32.mrf.mxu3  ;;  %1796 = vmatmul.msk.f32.gmra.mxu1 %vm413_vm1, %v1782_v47 }
 0x344   : > { %v1111_v53 = vadd.f32 %v1110_v51, %v971_v18  ;;  %v1812_v51 = vld [vmem:[%s2460_s3 + $0xb8] sm:$0x3f] }
 0x345   : > { %2003 = vtanh.f32 %v1082_v50 }
 0x346   : > { %2005 = vtanh.f32 %v1111_v53 }
 0x347   : > { %2007 = vtanh.f32 %v1079_v49 }
 0x348   : > { %2009 = vtanh.f32 %v1108_v52 }
 0x349   : > { %2011 = vtanh.f32 %v1076_v54 }
 0x34a   : > { %2013 = vtanh.f32 %v1105_v55  ;;  %1792 = vmatmul.msk.f32.gmra.mxu0 %vm413_vm1, %v1783_v58 }
 0x34b   : > { %v2004_v59 = vpop.eup %2003  ;;  %2015 = vtanh.f32 %v1073_v56  ;;  %1797 = vmatmul.msk.f32.gmra.mxu1 %vm413_vm1, %v1783_v58 }
 0x34c   : > { %v2006_v60 = vpop.eup %2005  ;;  %2017 = vtanh.f32 %v1102_v57  ;;  %1799 = vmatpush.msk.msra.mxu2 %vm426_vm0, %v2004_v59 }
 0x34d   : > { %v2008_v61 = vpop.eup %2007  ;;  %1804 = vmatpush.msk.msra.mxu3 %vm426_vm0, %v2006_v60 }
 0x34e   : > { %v2010_v62 = vpop.eup %2009  ;;  %1254 = vmatpush.msra.mxu2 %v2008_v61 }
 0x34f   : > { %v2012_v63 = vpop.eup %2011  ;;  %1283 = vmatpush.msra.mxu3 %v2010_v62 }
 0x350   : > { %v2014_v0 = vpop.eup %2013  ;;  %1255 = vmatpush.msra.mxu2 %v2012_v63 }
 0x351   : > { %v2016_v2 = vpop.eup %2015  ;;  %1284 = vmatpush.msra.mxu3 %v2014_v0 }
 0x352   : > { %v2018_v3 = vpop.eup %2017  ;;  %1256 = vmatpush.msra.mxu2 %v2016_v2  ;;  %1793 = vmatmul.msk.f32.gmra.mxu0 %vm413_vm1, %v1784_v1  ;;  %v1343_v2 = vpop.permute.xlu1 %1342 }
 0x353   : > { %1285 = vmatpush.msra.mxu3 %v2018_v3  ;;  %1798 = vmatmul.msk.f32.gmra.mxu1 %vm413_vm1, %v1784_v1  ;;  %v1338_v3 = vpop.permute.xlu2 %1337 }
 0x354   : > { %1800 = vmatmul.msk.f32.vlgmr.msra.gmra.mxu2 %vm413_vm1, %v1781_v42  ;;  %1805 = vmatmul.msk.f32.vlgmr.msra.gmra.mxu3 %vm413_vm1, %v1781_v42 }
 0x35c   : > { %1801 = vmatmul.msk.f32.gmra.mxu2 %vm413_vm1, %v1782_v47  ;;  %1806 = vmatmul.msk.f32.gmra.mxu3 %vm413_vm1, %v1782_v47 }
 0x364   : > { %1802 = vmatmul.msk.f32.gmra.mxu2 %vm413_vm1, %v1783_v58  ;;  %1807 = vmatmul.msk.f32.gmra.mxu3 %vm413_vm1, %v1783_v58 }
 0x36c   : > { %1803 = vmatmul.msk.f32.gmra.mxu2 %vm413_vm1, %v1784_v1  ;;  %1808 = vmatmul.msk.f32.gmra.mxu3 %vm413_vm1, %v1784_v1 }
 0x3b7   : > { %v1200_v4 = vpop.f32.mrf.mxu0 }
 0x3b8   : > { %v1229_v5 = vpop.f32.mrf.mxu1  ;;  %v1201_v22 = vadd.f32 %v1200_v4, %v1142_v20 }
 0x3b9   : > { %v1230_v23 = vadd.f32 %v1229_v5, %v1142_v20 }
 0x3bf   : > { %v1203_v6 = vpop.f32.mrf.mxu0 }
 0x3c0   : > { %v1232_v7 = vpop.f32.mrf.mxu1  ;;  %v1204_v19 = vadd.f32 %v1203_v6, %v1147_v16 }
 0x3c1   : > { %v1233_v21 = vadd.f32 %v1232_v7, %v1147_v16 }
 0x3c7   : > { %v1206_v8 = vpop.f32.mrf.mxu0 }
 0x3c8   : > { %v1235_v9 = vpop.f32.mrf.mxu1  ;;  %v1207_v13 = vadd.f32 %v1206_v8, %v1152_v11  ;;  %v1333_v8 = vpop.permute.xlu0 %1332 }
 0x3c9   : > { %v1236_v17 = vadd.f32 %v1235_v9, %v1152_v11 }
 0x3cf   : > { %v1209_v12 = vpop.f32.mrf.mxu0 }
 0x3d0   : > { %v1210_v14 = vadd.f32 %v1209_v12, %v1157_v10  ;;  %v1238_v15 = vpop.f32.mrf.mxu1  ;;  %v1328_v12 = vpop.permute.xlu1 %1327 }
 0x3d1   : > { %v1239_v18 = vadd.f32 %v1238_v15, %v1157_v10 }
 0x3d2   : > { %2019 = vtanh.f32 %v1210_v14 }
 0x3d3   : > { %2021 = vtanh.f32 %v1239_v18 }
 0x3d4   : > { %2023 = vtanh.f32 %v1207_v13 }
 0x3d5   : > { %2025 = vtanh.f32 %v1236_v17 }
 0x3d6   : > { %2027 = vtanh.f32 %v1204_v19 }
 0x3d7   : > { %v1258_v24 = vpop.f32.mrf.mxu2  ;;  %2029 = vtanh.f32 %v1233_v21  ;;  %v1287_v25 = vpop.f32.mrf.mxu3 }
 0x3d8   : > { %v2020_v26 = vpop.eup %2019  ;;  %2031 = vtanh.f32 %v1201_v22  ;;  %v1259_v49 = vadd.f32 %v1258_v24, %v1142_v20  ;;  %v1288_v50 = vadd.f32 %v1287_v25, %v1142_v20  ;;  %v1501_v24 = vld [vmem:[%s2462_s5] sm:$0x1] }
 0x3d9   : > { %v2022_v27 = vpop.eup %2021  ;;  %2033 = vtanh.f32 %v1230_v23  ;;  %1817 = vmatpush.msk.msrb.mxu0 %vm426_vm0, %v2020_v26 }
 0x3da   : > { %v2024_v28 = vpop.eup %2023  ;;  %1822 = vmatpush.msk.msrb.mxu1 %vm426_vm0, %v2022_v27 }
 0x3db   : > { %v2026_v29 = vpop.eup %2025  ;;  %1382 = vmatpush.msrb.mxu0 %v2024_v28 }
 0x3dc   : > { %v2028_v30 = vpop.eup %2027  ;;  %1411 = vmatpush.msrb.mxu1 %v2026_v29 }
 0x3dd   : > { %v2030_v31 = vpop.eup %2029  ;;  %1383 = vmatpush.msrb.mxu0 %v2028_v30 }
 0x3de   : > { %v2032_v33 = vpop.eup %2031  ;;  %1412 = vmatpush.msrb.mxu1 %v2030_v31 }
 0x3df   : > { %v1261_v34 = vpop.f32.mrf.mxu2  ;;  %v2034_v35 = vpop.eup %2033  ;;  %1384 = vmatpush.msrb.mxu0 %v2032_v33 }
 0x3e0   : > { %v1290_v36 = vpop.f32.mrf.mxu3  ;;  %1413 = vmatpush.msrb.mxu1 %v2034_v35  ;;  %1818 = vmatmul.msk.f32.vlgmr.msrb.gmra.mxu0 %vm413_vm1, %v1809_v32  ;;  %v1262_v47 = vadd.f32 %v1261_v34, %v1147_v16 }
 0x3e1   : > { %1823 = vmatmul.msk.f32.vlgmr.msrb.gmra.mxu1 %vm413_vm1, %v1809_v32  ;;  %v1291_v48 = vadd.f32 %v1290_v36, %v1147_v16 }
 0x3e7   : > { %v1264_v38 = vpop.f32.mrf.mxu2 }
 0x3e8   : > { %v1293_v39 = vpop.f32.mrf.mxu3  ;;  %1819 = vmatmul.msk.f32.gmra.mxu0 %vm413_vm1, %v1810_v37  ;;  %v1265_v42 = vadd.f32 %v1264_v38, %v1152_v11 }
 0x3e9   : > { %1824 = vmatmul.msk.f32.gmra.mxu1 %vm413_vm1, %v1810_v37  ;;  %v1294_v45 = vadd.f32 %v1293_v39, %v1152_v11 }
 0x3ef   : > { %v1267_v41 = vpop.f32.mrf.mxu2 }
 0x3f0   : > { %v1268_v43 = vadd.f32 %v1267_v41, %v1157_v10  ;;  %v1296_v44 = vpop.f32.mrf.mxu3  ;;  %1820 = vmatmul.msk.f32.gmra.mxu0 %vm413_vm1, %v1811_v40 }
 0x3f1   : > { %v1297_v46 = vadd.f32 %v1296_v44, %v1157_v10  ;;  %1825 = vmatmul.msk.f32.gmra.mxu1 %vm413_vm1, %v1811_v40 }
 0x3f2   : > { %2035 = vtanh.f32 %v1268_v43 }
 0x3f3   : > { %2037 = vtanh.f32 %v1297_v46 }
 0x3f4   : > { %2039 = vtanh.f32 %v1265_v42 }
 0x3f5   : > { %2041 = vtanh.f32 %v1294_v45 }
 0x3f6   : > { %2043 = vtanh.f32 %v1262_v47 }
 0x3f7   : > { %2045 = vtanh.f32 %v1291_v48 }
 0x3f8   : > { %v2036_v52 = vpop.eup %2035  ;;  %2047 = vtanh.f32 %v1259_v49  ;;  %1821 = vmatmul.msk.f32.gmra.mxu0 %vm413_vm1, %v1812_v51  ;;  %v1506_v49 = vpop.permute.xlu2 %1505 }
 0x3f9   : > { %v2038_v53 = vpop.eup %2037  ;;  %2049 = vtanh.f32 %v1288_v50  ;;  %1827 = vmatpush.msk.msrb.mxu2 %vm426_vm0, %v2036_v52  ;;  %1826 = vmatmul.msk.f32.gmra.mxu1 %vm413_vm1, %v1812_v51 }
 0x3fa   : > { %v2040_v54 = vpop.eup %2039  ;;  %1832 = vmatpush.msk.msrb.mxu3 %vm426_vm0, %v2038_v53 }
 0x3fb   : > { %v2042_v55 = vpop.eup %2041  ;;  %1440 = vmatpush.msrb.mxu2 %v2040_v54 }
 0x3fc   : > { %v2044_v56 = vpop.eup %2043  ;;  %1469 = vmatpush.msrb.mxu3 %v2042_v55 }
 0x3fd   : > { %v2046_v57 = vpop.eup %2045  ;;  %1441 = vmatpush.msrb.mxu2 %v2044_v56 }
 0x3fe   : > { %v2048_v58 = vpop.eup %2047  ;;  %1470 = vmatpush.msrb.mxu3 %v2046_v57  ;;  %v1618_v57 = vlaneseq }
 0x3ff   : > { %v2050_v59 = vpop.eup %2049  ;;  %1442 = vmatpush.msrb.mxu2 %v2048_v58 }
 0x400   : > { %1471 = vmatpush.msrb.mxu3 %v2050_v59  ;;  %1828 = vmatmul.msk.f32.vlgmr.msrb.gmra.mxu2 %vm413_vm1, %v1809_v32  ;;  %vm1620_vm5 = vcmp.lt.s32.totalorder %v1618_v57, 512 }
 0x401   : > { %1833 = vmatmul.msk.f32.vlgmr.msrb.gmra.mxu3 %vm413_vm1, %v1809_v32 }
 0x408   : > { %1829 = vmatmul.msk.f32.gmra.mxu2 %vm413_vm1, %v1810_v37 }
 0x409   : > { %1834 = vmatmul.msk.f32.gmra.mxu3 %vm413_vm1, %v1810_v37 }
 0x410   : > { %1830 = vmatmul.msk.f32.gmra.mxu2 %vm413_vm1, %v1811_v40 }
 0x411   : > { %1835 = vmatmul.msk.f32.gmra.mxu3 %vm413_vm1, %v1811_v40 }
 0x418   : > { %1831 = vmatmul.msk.f32.gmra.mxu2 %vm413_vm1, %v1812_v51 }
 0x419   : > { %1836 = vmatmul.msk.f32.gmra.mxu3 %vm413_vm1, %v1812_v51  ;;  %v1508_v51 = vperm.slane %v1506_v49, 0 }
 0x45d   : > { %v1386_v60 = vpop.f32.mrf.mxu0 }
 0x45e   : > { %v1415_v61 = vpop.f32.mrf.mxu1  ;;  %v1387_v14 = vadd.f32 %v1386_v60, %v1328_v12 }
 0x45f   : > { %v1416_v15 = vadd.f32 %v1415_v61, %v1328_v12 }
 0x465   : > { %v1389_v62 = vpop.f32.mrf.mxu0 }
 0x466   : > { %v1418_v63 = vpop.f32.mrf.mxu1  ;;  %v1390_v11 = vadd.f32 %v1389_v62, %v1333_v8 }
 0x467   : > { %v1419_v13 = vadd.f32 %v1418_v63, %v1333_v8 }
 0x46d   : > { %v1392_v0 = vpop.f32.mrf.mxu0 }
 0x46e   : > { %v1421_v1 = vpop.f32.mrf.mxu1  ;;  %v1393_v5 = vadd.f32 %v1392_v0, %v1338_v3 }
 0x46f   : > { %v1422_v9 = vadd.f32 %v1421_v1, %v1338_v3 }
 0x475   : > { %v1395_v4 = vpop.f32.mrf.mxu0 }
 0x476   : > { %v1396_v6 = vadd.f32 %v1395_v4, %v1343_v2  ;;  %v1424_v7 = vpop.f32.mrf.mxu1 }
 0x477   : > { %v1425_v10 = vadd.f32 %v1424_v7, %v1343_v2 }
 0x478   : > { %2051 = vtanh.f32 %v1396_v6 }
 0x479   : > { %2053 = vtanh.f32 %v1425_v10 }
 0x47a   : > { %2055 = vtanh.f32 %v1393_v5 }
 0x47b   : > { %2057 = vtanh.f32 %v1422_v9 }
 0x47c   : > { %2059 = vtanh.f32 %v1390_v11 }
 0x47d   : > { %2061 = vtanh.f32 %v1419_v13 }
 0x47e   : > { %v2052_v16 = vpop.eup %2051  ;;  %2063 = vtanh.f32 %v1387_v14 }
 0x47f   : > { %v2054_v17 = vpop.eup %2053  ;;  %2065 = vtanh.f32 %v1416_v15  ;;  %1837 = vmatpush.msk.msra.mxu0 %vm426_vm0, %v2052_v16 }
 0x480   : > { %v2056_v18 = vpop.eup %2055  ;;  %1839 = vmatpush.msk.msra.mxu1 %vm426_vm0, %v2054_v17 }
 0x481   : > { %v2058_v19 = vpop.eup %2057  ;;  %1537 = vmatpush.msra.mxu0 %v2056_v18 }
 0x482   : > { %v2060_v20 = vpop.eup %2059  ;;  %1557 = vmatpush.msra.mxu1 %v2058_v19 }
 0x483   : > { %v1444_v21 = vpop.f32.mrf.mxu2  ;;  %v2062_v22 = vpop.eup %2061  ;;  %1538 = vmatpush.msra.mxu0 %v2060_v20 }
 0x484   : > { %v1473_v23 = vpop.f32.mrf.mxu3  ;;  %v2064_v25 = vpop.eup %2063  ;;  %1558 = vmatpush.msra.mxu1 %v2062_v22  ;;  %v1445_v39 = vadd.f32 %v1444_v21, %v1328_v12 }
 0x485   : > { %v2066_v26 = vpop.eup %2065  ;;  %1539 = vmatpush.msra.mxu0 %v2064_v25  ;;  %v1474_v40 = vadd.f32 %v1473_v23, %v1328_v12 }
 0x486   : > { %1559 = vmatpush.msra.mxu1 %v2066_v26  ;;  %1838 = vmatmul.msk.f32.vlgmr.msra.gmra.mxu0 %vm413_vm1, %v1501_v24 }
 0x487   : > { %1840 = vmatmul.msk.f32.vlgmr.msra.gmra.mxu1 %vm413_vm1, %v1501_v24 }
 0x48b   : > { %v1447_v27 = vpop.f32.mrf.mxu2 }
 0x48c   : > { %v1476_v28 = vpop.f32.mrf.mxu3  ;;  %v1448_v37 = vadd.f32 %v1447_v27, %v1333_v8 }
 0x48d   : > { %v1477_v38 = vadd.f32 %v1476_v28, %v1333_v8 }
 0x493   : > { %v1450_v29 = vpop.f32.mrf.mxu2 }
 0x494   : > { %v1479_v30 = vpop.f32.mrf.mxu3  ;;  %v1451_v32 = vadd.f32 %v1450_v29, %v1338_v3 }
 0x495   : > { %v1480_v35 = vadd.f32 %v1479_v30, %v1338_v3 }
 0x49b   : > { %v1453_v31 = vpop.f32.mrf.mxu2 }
 0x49c   : > { %v1454_v33 = vadd.f32 %v1453_v31, %v1343_v2  ;;  %v1482_v34 = vpop.f32.mrf.mxu3 }
 0x49d   : > { %v1483_v36 = vadd.f32 %v1482_v34, %v1343_v2 }
 0x49e   : > { %2067 = vtanh.f32 %v1454_v33 }
 0x49f   : > { %2069 = vtanh.f32 %v1483_v36 }
 0x4a0   : > { %2071 = vtanh.f32 %v1451_v32 }
 0x4a1   : > { %2073 = vtanh.f32 %v1480_v35 }
 0x4a2   : > { %2075 = vtanh.f32 %v1448_v37 }
 0x4a3   : > { %2077 = vtanh.f32 %v1477_v38 }
 0x4a4   : > { %v2068_v41 = vpop.eup %2067  ;;  %2079 = vtanh.f32 %v1445_v39 }
 0x4a5   : > { %v2070_v42 = vpop.eup %2069  ;;  %2081 = vtanh.f32 %v1474_v40  ;;  %1841 = vmatpush.msk.msra.mxu2 %vm426_vm0, %v2068_v41 }
 0x4a6   : > { %v2072_v43 = vpop.eup %2071  ;;  %1843 = vmatpush.msk.msra.mxu3 %vm426_vm0, %v2070_v42 }
 0x4a7   : > { %v2074_v44 = vpop.eup %2073  ;;  %1577 = vmatpush.msra.mxu2 %v2072_v43 }
 0x4a8   : > { %v2076_v45 = vpop.eup %2075  ;;  %1597 = vmatpush.msra.mxu3 %v2074_v44 }
 0x4a9   : > { %v2078_v46 = vpop.eup %2077  ;;  %1578 = vmatpush.msra.mxu2 %v2076_v45 }
 0x4aa   : > { %v2080_v47 = vpop.eup %2079  ;;  %1598 = vmatpush.msra.mxu3 %v2078_v46 }
 0x4ab   : > { %v2082_v48 = vpop.eup %2081  ;;  %1579 = vmatpush.msra.mxu2 %v2080_v47 }
 0x4ac   : > { %1599 = vmatpush.msra.mxu3 %v2082_v48  ;;  %1842 = vmatmul.msk.f32.vlgmr.msra.gmra.mxu2 %vm413_vm1, %v1501_v24 }
 0x4ad   : > { %1844 = vmatmul.msk.f32.vlgmr.msra.gmra.mxu3 %vm413_vm1, %v1501_v24 }
 0x503   : > { %v1541_v54 = vpop.f32.mrf.mxu0 }
 0x504   : > { %v1561_v50 = vpop.f32.mrf.mxu1  ;;  %v1542_v61 = vadd.f32 %v1541_v54, %v1508_v51 }
 0x505   : > { %v1562_v52 = vadd.f32 %v1561_v50, %v1508_v51 }
 0x507   : > { %v1608_v58 = vrot.slane %v1562_v52, 7 }
 0x509   : > { %v1612_v63 = vsel %vm1611_vm2, %v1542_v61, %v1608_v58 }
 0x52f   : > { %v1581_v53 = vpop.f32.mrf.mxu2 }
 0x530   : > { %v1582_v55 = vadd.f32 %v1581_v53, %v1508_v51  ;;  %v1601_v56 = vpop.f32.mrf.mxu3 }
 0x531   : > { %v1602_v59 = vadd.f32 %v1601_v56, %v1508_v51 }
 0x532   : > { %v1609_v60 = vrot.slane %v1582_v55, 6 }
 0x533   : > { %v1610_v62 = vrot.slane %v1602_v59, 5 }
 0x535   : > { %v1614_v0 = vsel %vm1613_vm3, %v1609_v60, %v1610_v62 }
 0x536   : > { %v1616_v1 = vsel %vm1615_vm4, %v1612_v63, %v1614_v0 }
 0x537   : > { %1622 = vst.msk [vmem:[%s277_s13] sm:$0xf] %vm1620_vm5, %v1616_v1 }
 0x538 PF: > { %s19_s26 = sadd.s32 1, %s2089_s26  }
 0x539   : > { %p16_p4 = scmp.ge.s32.totalorder %s19_s26, 4  }
 0x53b   :  { %18 = sbr.rel (!%p16_p4) target bundleno = 3 (0x3), region = 88 }

</bundles_post_ra>
